<compile_context>
chip_gen: v6e
topology: v6e:2x2x1
jax: 0.10.0
libtpu: 0.0.40
codegen_flags: <defaults>
</compile_context>

<pallas_src>
import functools

import jax
import jax.numpy as jnp
from jax.experimental import pallas as pl
from jax.experimental.pallas import tpu as pltpu


def _actor_kernel(max_action,
                  x_ref,
                  w1_ref, b1_ref, g_ref, be_ref,
                  w2_ref, b2_ref,
                  w3_ref, b3_ref,
                  w4_ref, b4_ref,
                  w5_ref, b5_ref,
                  w6_ref, b6_ref,
                  out_ref):
    f32 = jnp.float32
    bf16 = jnp.bfloat16

    x = x_ref[...]                                            # (TB, state_dim) bf16

    # --- base_features: Linear(state_dim,256) -> ReLU -> LayerNorm(256)
    #     -> Dropout(eval: identity) -> Linear(256,128) -> ReLU
    h = jnp.dot(x, w1_ref[...], preferred_element_type=f32) + b1_ref[...]
    h = jnp.maximum(h, 0.0)                                   # (TB, 256), f32

    # centered two-pass LayerNorm stats (biased variance, as torch)
    mu = jnp.mean(h, axis=-1, keepdims=True)
    d = h - mu
    var = jnp.mean(d * d, axis=-1, keepdims=True)
    h = d * jax.lax.rsqrt(var + 1e-5) * g_ref[...] + be_ref[...]

    base = jnp.dot(h.astype(bf16), w2_ref[...],
                   preferred_element_type=f32) + b2_ref[...]
    base = jnp.maximum(base, 0.0)                             # (TB, 128)

    # combined = cat([base, zeros(64), zeros(64)]) @ W3  ==  base @ W3[:128, :]
    # (w3_ref already holds only those 128 rows; zero partials dropped).
    t = jnp.dot(base.astype(bf16), w3_ref[...],
                preferred_element_type=f32) + b3_ref[...]
    t = jnp.maximum(t, 0.0)                                   # (TB, 128)
    t = jnp.dot(t.astype(bf16), w4_ref[...],
                preferred_element_type=f32) + b4_ref[...]
    t = jnp.maximum(t, 0.0)                                   # (TB, 64)

    # policy_net: Linear(64,32) -> ReLU -> Linear(32,action_dim) -> Tanh
    p = jnp.dot(t.astype(bf16), w5_ref[...],
                preferred_element_type=f32) + b5_ref[...]
    p = jnp.maximum(p, 0.0)                                   # (TB, 32)
    a = jnp.tanh(jnp.dot(p.astype(bf16), w6_ref[...],
                         preferred_element_type=f32) + b6_ref[...])

    out_ref[...] = max_action * a                             # (TB, action_dim)


def prepare_actor_params(params):
    """One-time preprocessing (dtype casts + dead-weight slice), hoisted out of
    the per-call path.  Call once; reuse the returned tuple."""
    bf16, f32 = jnp.bfloat16, jnp.float32
    return (
        params["w1"].astype(bf16),        params["b1"].astype(f32),
        params["ln_g"].astype(f32),       params["ln_b"].astype(f32),
        params["w2"].astype(bf16),        params["b2"].astype(f32),
        # gnn/temporal feature blocks are identically zero, so only the first
        # 128 rows of W3 contribute -> never DMA the dead half.
        params["w3"][:128, :].astype(bf16), params["b3"].astype(f32),
        params["w4"].astype(bf16),        params["b4"].astype(f32),
        params["w5"].astype(bf16),        params["b5"].astype(f32),
        params["w6"].astype(bf16),        params["b6"].astype(f32),
    )


@functools.partial(jax.jit, static_argnames=("max_action", "tile_b"))
def heterogeneous_actor_forward(state, weights, *, max_action, tile_b=1024):
    """Pallas-backed forward for HeterogeneousActor(state) with default
    edge_index / temporal_seq / batch (all None).  `weights` comes from
    prepare_actor_params()."""
    if state.ndim == 1:                       # mirrors state.unsqueeze(0)
        state = state[None, :]
    B, state_dim = state.shape
    action_dim = weights[12].shape[1]         # w6: (32, action_dim)

    # Batch tiling: multiple of 16 for dense bf16 sublane packing.  Footprint
    # at tile_b=1024 is only a few MiB -> safe on v5e/v6e (128 MiB VMEM) and
    # v7x (64 MiB); no VMEM-driven retiling needed on any generation.
    b16 = ((B + 15) // 16) * 16
    tile_b = max(16, (int(tile_b) // 16) * 16)
    tile_b = min(tile_b, b16)
    # v7x megacore: for large batches cap the tile so the "parallel" grid has
    # >= 2 blocks (one per TensorCore).  Skipped for small batches where the
    # extra grid step only adds overhead on single-TC v5e/v6e.
    half = ((pl.cdiv(B, 2) + 15) // 16) * 16
    if half >= 256:
        tile_b = min(tile_b, half)

    n_blocks = pl.cdiv(b16, tile_b)
    b_pad = n_blocks * tile_b

    # Input stream in bf16 (halves the only input DMA); pad batch to the tile.
    state = state.astype(jnp.bfloat16)
    if b_pad != B:
        state = jnp.pad(state, ((0, b_pad - B), (0, 0)))

    def resident(a):
        # Full-array block with constant index -> fetched once, stays in VMEM
        # across all grid steps.
        return pl.BlockSpec(a.shape, lambda i: (0,) * a.ndim)

    out = pl.pallas_call(
        functools.partial(_actor_kernel, float(max_action)),
        # Narrow output (full last dim is a legal BlockSpec): HBM writeback is
        # only the live action_dim lanes instead of a 128-lane f32 slab.
        out_shape=jax.ShapeDtypeStruct((b_pad, action_dim), jnp.float32),
        grid=(n_blocks,),
        in_specs=[pl.BlockSpec((tile_b, state_dim), lambda i: (i, 0))]
                 + [resident(a) for a in weights],
        out_specs=pl.BlockSpec((tile_b, action_dim), lambda i: (i, 0)),
        compiler_params=pltpu.CompilerParams(
            dimension_semantics=("parallel",)),
    )(state, *weights)

    # Padded batch rows never reach the caller (slice fuses under jit).
    return out[:B]


def init_params(key, state_dim, action_dim):
    """Deterministic synthetic parameters (PyTorch-Linear-style uniform init)."""
    def linear(k, fan_in, fan_out):
        kw, kb = jax.random.split(k)
        bound = 1.0 / float(fan_in) ** 0.5
        w = jax.random.uniform(kw, (fan_in, fan_out), jnp.float32, -bound, bound)
        b = jax.random.uniform(kb, (1, fan_out), jnp.float32, -bound, bound)
        return w, b

    ks = jax.random.split(key, 6)
    w1, b1 = linear(ks[0], state_dim, 256)      # base_features[0]
    w2, b2 = linear(ks[1], 256, 128)            # base_features[4]
    w3, b3 = linear(ks[2], 128 + 64 + 64, 128)  # type_specific[0]
    w4, b4 = linear(ks[3], 128, 64)             # type_specific[2]
    w5, b5 = linear(ks[4], 64, 32)              # policy_net[0]
    w6, b6 = linear(ks[5], 32, action_dim)      # policy_net[2]
    return dict(
        w1=w1, b1=b1,
        ln_g=jnp.ones((1, 256), jnp.float32),   # LayerNorm(256) weight
        ln_b=jnp.zeros((1, 256), jnp.float32),  # LayerNorm(256) bias
        w2=w2, b2=b2, w3=w3, b3=b3, w4=w4, b4=b4, w5=w5, b5=b5, w6=w6, b6=b6,
    )


def _reference_forward(state, p, max_action):
    """Pure-jnp reference mirroring the kernel's numerics (bf16 matmul operands,
    f32 accumulation / elementwise, centered LayerNorm)."""
    bf16, f32 = jnp.bfloat16, jnp.float32

    def dot(a, w):
        return jnp.dot(a.astype(bf16), w.astype(bf16), preferred_element_type=f32)

    if state.ndim == 1:
        state = state[None, :]
    h = jnp.maximum(dot(state, p["w1"]) + p["b1"], 0.0)
    mu = jnp.mean(h, axis=-1, keepdims=True)
    d = h - mu
    var = jnp.mean(d * d, axis=-1, keepdims=True)
    h = d * jax.lax.rsqrt(var + 1e-5) * p["ln_g"] + p["ln_b"]
    base = jnp.maximum(dot(h, p["w2"]) + p["b2"], 0.0)
    # zero gnn/temporal blocks -> only first 128 rows of w3 matter
    t = jnp.maximum(dot(base, p["w3"][:128, :]) + p["b3"], 0.0)
    t = jnp.maximum(dot(t, p["w4"]) + p["b4"], 0.0)
    pp = jnp.maximum(dot(t, p["w5"]) + p["b5"], 0.0)
    return max_action * jnp.tanh(dot(pp, p["w6"]) + p["b6"])


if __name__ == "__main__":
    key = jax.random.PRNGKey(0)
    k_param, k_state = jax.random.split(key)

    batch = 4
    state_dim = 16
    action_dim = 4
    max_action = 2.0

    params = init_params(k_param, state_dim, action_dim)
    weights = prepare_actor_params(params)          # one-time cast/slice, reused per call
    state = jax.random.normal(k_state, (batch, state_dim), jnp.float32)

    action = heterogeneous_actor_forward(state, weights, max_action=max_action)
    action = jax.block_until_ready(action)

    ref = _reference_forward(state, params, max_action)
    assert action.shape == (batch, action_dim)
    assert jnp.allclose(action, ref, atol=2e-3, rtol=2e-2), "mismatch vs reference"

    print("KERNEL_OK")
</pallas_src>

<mosaic_0001>
module attributes {stable_mosaic.version = 11 : i64} {
  func.func @_actor_kernel(%arg0: i32, %arg1: memref<16x16xbf16, #tpu.memory_space<vmem>>, %arg2: memref<16x256xbf16, #tpu.memory_space<vmem>>, %arg3: memref<1x256xf32, #tpu.memory_space<vmem>>, %arg4: memref<1x256xf32, #tpu.memory_space<vmem>>, %arg5: memref<1x256xf32, #tpu.memory_space<vmem>>, %arg6: memref<256x128xbf16, #tpu.memory_space<vmem>>, %arg7: memref<1x128xf32, #tpu.memory_space<vmem>>, %arg8: memref<128x128xbf16, #tpu.memory_space<vmem>>, %arg9: memref<1x128xf32, #tpu.memory_space<vmem>>, %arg10: memref<128x64xbf16, #tpu.memory_space<vmem>>, %arg11: memref<1x64xf32, #tpu.memory_space<vmem>>, %arg12: memref<64x32xbf16, #tpu.memory_space<vmem>>, %arg13: memref<1x32xf32, #tpu.memory_space<vmem>>, %arg14: memref<32x4xbf16, #tpu.memory_space<vmem>>, %arg15: memref<1x4xf32, #tpu.memory_space<vmem>>, %arg16: memref<16x4xf32, #tpu.memory_space<vmem>>) attributes {dimension_semantics = [#tpu.dimension_semantics<parallel>], iteration_bounds = array<i64: 1>, scalar_prefetch = 0 : i64, scratch_operands = 0 : i64, tpu.core_type = #tpu.core_type<tc>, window_params = [{transform_indices = @transform_0, window_bounds = array<i64: 16, 16>}, {pipeline_mode = #tpu.pipeline_mode<synchronous>, transform_indices = @transform_1, window_bounds = array<i64: 16, 256>}, {pipeline_mode = #tpu.pipeline_mode<synchronous>, transform_indices = @transform_2, window_bounds = array<i64: 1, 256>}, {pipeline_mode = #tpu.pipeline_mode<synchronous>, transform_indices = @transform_3, window_bounds = array<i64: 1, 256>}, {pipeline_mode = #tpu.pipeline_mode<synchronous>, transform_indices = @transform_4, window_bounds = array<i64: 1, 256>}, {pipeline_mode = #tpu.pipeline_mode<synchronous>, transform_indices = @transform_5, window_bounds = array<i64: 256, 128>}, {pipeline_mode = #tpu.pipeline_mode<synchronous>, transform_indices = @transform_6, window_bounds = array<i64: 1, 128>}, {pipeline_mode = #tpu.pipeline_mode<synchronous>, transform_indices = @transform_7, window_bounds = array<i64: 128, 128>}, {pipeline_mode = #tpu.pipeline_mode<synchronous>, transform_indices = @transform_8, window_bounds = array<i64: 1, 128>}, {pipeline_mode = #tpu.pipeline_mode<synchronous>, transform_indices = @transform_9, window_bounds = array<i64: 128, 64>}, {pipeline_mode = #tpu.pipeline_mode<synchronous>, transform_indices = @transform_10, window_bounds = array<i64: 1, 64>}, {pipeline_mode = #tpu.pipeline_mode<synchronous>, transform_indices = @transform_11, window_bounds = array<i64: 64, 32>}, {pipeline_mode = #tpu.pipeline_mode<synchronous>, transform_indices = @transform_12, window_bounds = array<i64: 1, 32>}, {pipeline_mode = #tpu.pipeline_mode<synchronous>, transform_indices = @transform_13, window_bounds = array<i64: 32, 4>}, {pipeline_mode = #tpu.pipeline_mode<synchronous>, transform_indices = @transform_14, window_bounds = array<i64: 1, 4>}, {transform_indices = @transform_15, window_bounds = array<i64: 16, 4>}]} {
    %c0 = arith.constant 0 : index
    %c0_0 = arith.constant 0 : index
    %0 = vector.load %arg1[%c0, %c0_0] : memref<16x16xbf16, #tpu.memory_space<vmem>>, vector<16x16xbf16>
    %c0_1 = arith.constant 0 : index
    %c0_2 = arith.constant 0 : index
    %1 = vector.load %arg2[%c0_1, %c0_2] : memref<16x256xbf16, #tpu.memory_space<vmem>>, vector<16x256xbf16>
    %cst = arith.constant dense<0.000000e+00> : vector<16x256xf32>
    %2 = tpu.matmul %0, %1, %cst {dimension_numbers = #tpu.dot_dimension_numbers<[1], [0], [0], [1], [0, 0, 1, 1], [], []>} : vector<16x16xbf16>, vector<16x256xbf16>, vector<16x256xf32> -> vector<16x256xf32>
    %c0_3 = arith.constant 0 : index
    %c0_4 = arith.constant 0 : index
    %3 = vector.load %arg3[%c0_3, %c0_4] : memref<1x256xf32, #tpu.memory_space<vmem>>, vector<1x256xf32>
    %4 = vector.broadcast %3 : vector<1x256xf32> to vector<16x256xf32>
    %5 = arith.addf %2, %4 : vector<16x256xf32>
    %cst_5 = arith.constant 0.000000e+00 : f32
    %6 = vector.broadcast %cst_5 : f32 to vector<16x256xf32>
    %7 = arith.maximumf %5, %6 : vector<16x256xf32>
    %cst_6 = arith.constant dense<0.000000e+00> : vector<16xf32>
    %8 = vector.multi_reduction <add>, %7, %cst_6 [1] : vector<16x256xf32> to vector<16xf32>
    %9 = vector.shape_cast %8 : vector<16xf32> to vector<16x1xf32>
    %cst_7 = arith.constant 2.560000e+02 : f32
    %10 = vector.broadcast %cst_7 : f32 to vector<16x1xf32>
    %11 = arith.divf %9, %10 : vector<16x1xf32>
    %12 = vector.broadcast %11 : vector<16x1xf32> to vector<16x256xf32>
    %13 = arith.subf %7, %12 : vector<16x256xf32>
    %14 = arith.mulf %13, %13 : vector<16x256xf32>
    %cst_8 = arith.constant dense<0.000000e+00> : vector<16xf32>
    %15 = vector.multi_reduction <add>, %14, %cst_8 [1] : vector<16x256xf32> to vector<16xf32>
    %16 = vector.shape_cast %15 : vector<16xf32> to vector<16x1xf32>
    %cst_9 = arith.constant 2.560000e+02 : f32
    %17 = vector.broadcast %cst_9 : f32 to vector<16x1xf32>
    %18 = arith.divf %16, %17 : vector<16x1xf32>
    %cst_10 = arith.constant 9.99999974E-6 : f32
    %19 = vector.broadcast %cst_10 : f32 to vector<16x1xf32>
    %20 = arith.addf %18, %19 : vector<16x1xf32>
    %21 = math.rsqrt %20 : vector<16x1xf32>
    %22 = vector.broadcast %21 : vector<16x1xf32> to vector<16x256xf32>
    %23 = arith.mulf %13, %22 : vector<16x256xf32>
    %c0_11 = arith.constant 0 : index
    %c0_12 = arith.constant 0 : index
    %24 = vector.load %arg4[%c0_11, %c0_12] : memref<1x256xf32, #tpu.memory_space<vmem>>, vector<1x256xf32>
    %25 = vector.broadcast %24 : vector<1x256xf32> to vector<16x256xf32>
    %26 = arith.mulf %23, %25 : vector<16x256xf32>
    %c0_13 = arith.constant 0 : index
    %c0_14 = arith.constant 0 : index
    %27 = vector.load %arg5[%c0_13, %c0_14] : memref<1x256xf32, #tpu.memory_space<vmem>>, vector<1x256xf32>
    %28 = vector.broadcast %27 : vector<1x256xf32> to vector<16x256xf32>
    %29 = arith.addf %26, %28 : vector<16x256xf32>
    %30 = arith.truncf %29 : vector<16x256xf32> to vector<16x256xbf16>
    %c0_15 = arith.constant 0 : index
    %c0_16 = arith.constant 0 : index
    %31 = vector.load %arg6[%c0_15, %c0_16] : memref<256x128xbf16, #tpu.memory_space<vmem>>, vector<256x128xbf16>
    %cst_17 = arith.constant dense<0.000000e+00> : vector<16x128xf32>
    %32 = tpu.matmul %30, %31, %cst_17 {dimension_numbers = #tpu.dot_dimension_numbers<[1], [0], [0], [1], [0, 0, 1, 1], [], []>} : vector<16x256xbf16>, vector<256x128xbf16>, vector<16x128xf32> -> vector<16x128xf32>
    %c0_18 = arith.constant 0 : index
    %c0_19 = arith.constant 0 : index
    %33 = vector.load %arg7[%c0_18, %c0_19] : memref<1x128xf32, #tpu.memory_space<vmem>>, vector<1x128xf32>
    %34 = vector.broadcast %33 : vector<1x128xf32> to vector<16x128xf32>
    %35 = arith.addf %32, %34 : vector<16x128xf32>
    %cst_20 = arith.constant 0.000000e+00 : f32
    %36 = vector.broadcast %cst_20 : f32 to vector<16x128xf32>
    %37 = arith.maximumf %35, %36 : vector<16x128xf32>
    %38 = arith.truncf %37 : vector<16x128xf32> to vector<16x128xbf16>
    %c0_21 = arith.constant 0 : index
    %c0_22 = arith.constant 0 : index
    %39 = vector.load %arg8[%c0_21, %c0_22] : memref<128x128xbf16, #tpu.memory_space<vmem>>, vector<128x128xbf16>
    %cst_23 = arith.constant dense<0.000000e+00> : vector<16x128xf32>
    %40 = tpu.matmul %38, %39, %cst_23 {dimension_numbers = #tpu.dot_dimension_numbers<[1], [0], [0], [1], [0, 0, 1, 1], [], []>} : vector<16x128xbf16>, vector<128x128xbf16>, vector<16x128xf32> -> vector<16x128xf32>
    %c0_24 = arith.constant 0 : index
    %c0_25 = arith.constant 0 : index
    %41 = vector.load %arg9[%c0_24, %c0_25] : memref<1x128xf32, #tpu.memory_space<vmem>>, vector<1x128xf32>
    %42 = vector.broadcast %41 : vector<1x128xf32> to vector<16x128xf32>
    %43 = arith.addf %40, %42 : vector<16x128xf32>
    %cst_26 = arith.constant 0.000000e+00 : f32
    %44 = vector.broadcast %cst_26 : f32 to vector<16x128xf32>
    %45 = arith.maximumf %43, %44 : vector<16x128xf32>
    %46 = arith.truncf %45 : vector<16x128xf32> to vector<16x128xbf16>
    %c0_27 = arith.constant 0 : index
    %c0_28 = arith.constant 0 : index
    %47 = vector.load %arg10[%c0_27, %c0_28] : memref<128x64xbf16, #tpu.memory_space<vmem>>, vector<128x64xbf16>
    %cst_29 = arith.constant dense<0.000000e+00> : vector<16x64xf32>
    %48 = tpu.matmul %46, %47, %cst_29 {dimension_numbers = #tpu.dot_dimension_numbers<[1], [0], [0], [1], [0, 0, 1, 1], [], []>} : vector<16x128xbf16>, vector<128x64xbf16>, vector<16x64xf32> -> vector<16x64xf32>
    %c0_30 = arith.constant 0 : index
    %c0_31 = arith.constant 0 : index
    %49 = vector.load %arg11[%c0_30, %c0_31] : memref<1x64xf32, #tpu.memory_space<vmem>>, vector<1x64xf32>
    %50 = vector.broadcast %49 : vector<1x64xf32> to vector<16x64xf32>
    %51 = arith.addf %48, %50 : vector<16x64xf32>
    %cst_32 = arith.constant 0.000000e+00 : f32
    %52 = vector.broadcast %cst_32 : f32 to vector<16x64xf32>
    %53 = arith.maximumf %51, %52 : vector<16x64xf32>
    %54 = arith.truncf %53 : vector<16x64xf32> to vector<16x64xbf16>
    %c0_33 = arith.constant 0 : index
    %c0_34 = arith.constant 0 : index
    %55 = vector.load %arg12[%c0_33, %c0_34] : memref<64x32xbf16, #tpu.memory_space<vmem>>, vector<64x32xbf16>
    %cst_35 = arith.constant dense<0.000000e+00> : vector<16x32xf32>
    %56 = tpu.matmul %54, %55, %cst_35 {dimension_numbers = #tpu.dot_dimension_numbers<[1], [0], [0], [1], [0, 0, 1, 1], [], []>} : vector<16x64xbf16>, vector<64x32xbf16>, vector<16x32xf32> -> vector<16x32xf32>
    %c0_36 = arith.constant 0 : index
    %c0_37 = arith.constant 0 : index
    %57 = vector.load %arg13[%c0_36, %c0_37] : memref<1x32xf32, #tpu.memory_space<vmem>>, vector<1x32xf32>
    %58 = vector.broadcast %57 : vector<1x32xf32> to vector<16x32xf32>
    %59 = arith.addf %56, %58 : vector<16x32xf32>
    %cst_38 = arith.constant 0.000000e+00 : f32
    %60 = vector.broadcast %cst_38 : f32 to vector<16x32xf32>
    %61 = arith.maximumf %59, %60 : vector<16x32xf32>
    %62 = arith.truncf %61 : vector<16x32xf32> to vector<16x32xbf16>
    %c0_39 = arith.constant 0 : index
    %c0_40 = arith.constant 0 : index
    %63 = vector.load %arg14[%c0_39, %c0_40] : memref<32x4xbf16, #tpu.memory_space<vmem>>, vector<32x4xbf16>
    %cst_41 = arith.constant dense<0.000000e+00> : vector<16x4xf32>
    %64 = tpu.matmul %62, %63, %cst_41 {dimension_numbers = #tpu.dot_dimension_numbers<[1], [0], [0], [1], [0, 0, 1, 1], [], []>} : vector<16x32xbf16>, vector<32x4xbf16>, vector<16x4xf32> -> vector<16x4xf32>
    %c0_42 = arith.constant 0 : index
    %c0_43 = arith.constant 0 : index
    %65 = vector.load %arg15[%c0_42, %c0_43] : memref<1x4xf32, #tpu.memory_space<vmem>>, vector<1x4xf32>
    %66 = vector.broadcast %65 : vector<1x4xf32> to vector<16x4xf32>
    %67 = arith.addf %64, %66 : vector<16x4xf32>
    %68 = math.tanh %67 : vector<16x4xf32>
    %cst_44 = arith.constant 2.000000e+00 : f32
    %69 = vector.broadcast %cst_44 : f32 to vector<16x4xf32>
    %70 = arith.mulf %69, %68 : vector<16x4xf32>
    %c0_45 = arith.constant 0 : index
    %c0_46 = arith.constant 0 : index
    %71 = vector.load %arg16[%c0_45, %c0_46] : memref<16x4xf32, #tpu.memory_space<vmem>>, vector<16x4xf32>
    tpu.vector_store %arg16[%c0_45, %c0_46], %70 {strides = array<i32>} : memref<16x4xf32, #tpu.memory_space<vmem>>, vector<16x4xf32>,
    return
  }
  func.func @transform_0(%arg0: i32) -> (i32, i32) {
    %c0_i32 = arith.constant 0 : i32
    %c0_i32_0 = arith.constant 0 : i32
    return %arg0, %c0_i32 : i32, i32
  }
  func.func @transform_1(%arg0: i32) -> (i32, i32) {
    %c0_i32 = arith.constant 0 : i32
    %c0_i32_0 = arith.constant 0 : i32
    %c0_i32_1 = arith.constant 0 : i32
    return %c0_i32, %c0_i32_0 : i32, i32
  }
  func.func @transform_2(%arg0: i32) -> (i32, i32) {
    %c0_i32 = arith.constant 0 : i32
    %c0_i32_0 = arith.constant 0 : i32
    %c0_i32_1 = arith.constant 0 : i32
    return %c0_i32, %c0_i32_0 : i32, i32
  }
  func.func @transform_3(%arg0: i32) -> (i32, i32) {
    %c0_i32 = arith.constant 0 : i32
    %c0_i32_0 = arith.constant 0 : i32
    %c0_i32_1 = arith.constant 0 : i32
    return %c0_i32, %c0_i32_0 : i32, i32
  }
  func.func @transform_4(%arg0: i32) -> (i32, i32) {
    %c0_i32 = arith.constant 0 : i32
    %c0_i32_0 = arith.constant 0 : i32
    %c0_i32_1 = arith.constant 0 : i32
    return %c0_i32, %c0_i32_0 : i32, i32
  }
  func.func @transform_5(%arg0: i32) -> (i32, i32) {
    %c0_i32 = arith.constant 0 : i32
    %c0_i32_0 = arith.constant 0 : i32
    %c0_i32_1 = arith.constant 0 : i32
    return %c0_i32, %c0_i32_0 : i32, i32
  }
  func.func @transform_6(%arg0: i32) -> (i32, i32) {
    %c0_i32 = arith.constant 0 : i32
    %c0_i32_0 = arith.constant 0 : i32
    %c0_i32_1 = arith.constant 0 : i32
    return %c0_i32, %c0_i32_0 : i32, i32
  }
  func.func @transform_7(%arg0: i32) -> (i32, i32) {
    %c0_i32 = arith.constant 0 : i32
    %c0_i32_0 = arith.constant 0 : i32
    %c0_i32_1 = arith.constant 0 : i32
    return %c0_i32, %c0_i32_0 : i32, i32
  }
  func.func @transform_8(%arg0: i32) -> (i32, i32) {
    %c0_i32 = arith.constant 0 : i32
    %c0_i32_0 = arith.constant 0 : i32
    %c0_i32_1 = arith.constant 0 : i32
    return %c0_i32, %c0_i32_0 : i32, i32
  }
  func.func @transform_9(%arg0: i32) -> (i32, i32) {
    %c0_i32 = arith.constant 0 : i32
    %c0_i32_0 = arith.constant 0 : i32
    %c0_i32_1 = arith.constant 0 : i32
    return %c0_i32, %c0_i32_0 : i32, i32
  }
  func.func @transform_10(%arg0: i32) -> (i32, i32) {
    %c0_i32 = arith.constant 0 : i32
    %c0_i32_0 = arith.constant 0 : i32
    %c0_i32_1 = arith.constant 0 : i32
    return %c0_i32, %c0_i32_0 : i32, i32
  }
  func.func @transform_11(%arg0: i32) -> (i32, i32) {
    %c0_i32 = arith.constant 0 : i32
    %c0_i32_0 = arith.constant 0 : i32
    %c0_i32_1 = arith.constant 0 : i32
    return %c0_i32, %c0_i32_0 : i32, i32
  }
  func.func @transform_12(%arg0: i32) -> (i32, i32) {
    %c0_i32 = arith.constant 0 : i32
    %c0_i32_0 = arith.constant 0 : i32
    %c0_i32_1 = arith.constant 0 : i32
    return %c0_i32, %c0_i32_0 : i32, i32
  }
  func.func @transform_13(%arg0: i32) -> (i32, i32) {
    %c0_i32 = arith.constant 0 : i32
    %c0_i32_0 = arith.constant 0 : i32
    %c0_i32_1 = arith.constant 0 : i32
    return %c0_i32, %c0_i32_0 : i32, i32
  }
  func.func @transform_14(%arg0: i32) -> (i32, i32) {
    %c0_i32 = arith.constant 0 : i32
    %c0_i32_0 = arith.constant 0 : i32
    %c0_i32_1 = arith.constant 0 : i32
    return %c0_i32, %c0_i32_0 : i32, i32
  }
  func.func @transform_15(%arg0: i32) -> (i32, i32) {
    %c0_i32 = arith.constant 0 : i32
    %c0_i32_0 = arith.constant 0 : i32
    return %arg0, %c0_i32 : i32, i32
  }
}

</mosaic_0001>

<bundles_post_ra>
// kernel: heterogeneous_actor_forward.1
= control target key start
LH: loop header
LB: loop body
LE: loop exit
PB: predicated region body
PF: predicated region fallthrough
CT: control target
= control target key end

     0   :  { %20 = vsyncpa [#allocation3], 0  ;;  %s1343_s0 = inlined_call_operand.vmem [shape: bf16[16,16], index: 0, kind: input, shape index: {}]   ;;  %s1344_s1 = inlined_call_operand.hbm [shape: bf16[16,256], index: 1, kind: input, shape index: {}]   ;;  %s1345_s2 = inlined_call_operand.vmem [shape: f32[1,256], index: 2, kind: input, shape index: {}]   ;;  %s1346_s3 = inlined_call_operand.vmem [shape: f32[1,256], index: 3, kind: input, shape index: {}]   ;;  %s1347_s4 = inlined_call_operand.vmem [shape: f32[1,256], index: 4, kind: input, shape index: {}]   ;;  %s1348_s5 = inlined_call_operand.vmem [shape: bf16[256,128], index: 5, kind: input, shape index: {}]   ;;  %s1349_s6 = inlined_call_operand.vmem [shape: f32[1,128], index: 6, kind: input, shape index: {}]   ;;  %s1350_s7 = inlined_call_operand.hbm [shape: bf16[128,128], index: 7, kind: input, shape index: {}]   ;;  %s1351_s8 = inlined_call_operand.vmem [shape: f32[1,128], index: 8, kind: input, shape index: {}]   ;;  %s1352_s9 = inlined_call_operand.vmem [shape: bf16[128,64], index: 9, kind: input, shape index: {}]   ;;  %s1353_s10 = inlined_call_operand.vmem [shape: f32[1,64], index: 10, kind: input, shape index: {}]   ;;  %s1354_s11 = inlined_call_operand.vmem [shape: bf16[64,32], index: 11, kind: input, shape index: {}]   ;;  %s1355_s12 = inlined_call_operand.vmem [shape: f32[1,32], index: 12, kind: input, shape index: {}]   ;;  %s1356_s13 = inlined_call_operand.vmem [shape: bf16[32,4], index: 13, kind: input, shape index: {}]   ;;  %s1357_s14 = inlined_call_operand.vmem [shape: f32[1,4], index: 14, kind: input, shape index: {}]   ;;  %s1358_s15 = inlined_call_operand.vmem [shape: f32[16,4], index: 15, kind: output, shape index: {}]  }
   0x1   :  { %21 = vsyncpa [#allocation5], 0  ;;  %s1065_s18 = smov [#allocation2]  }
   0x2   :  { %s29_s19 = sshll.u32 %s1065_s18, 4  ;;  %s30_s19 = int_to_ptr.vmem [resolvable:$true] %s29_s19 }
   0x3   :  { %s1029_s20 = scalar_lea.vmem %s30_s19, 256  ;;  %p1034_p1 = scmp.lt.s32.totalorder %s30_s19, %s30_s19 }
   0x4   :  { %p1030_p0 = scmp.ne.s32.totalorder %s30_s19, %s1029_s20  ;;  %p1035_p2 = scmp.lt.s32.totalorder %s1029_s20, %s1029_s20 }
   0x6   :  { %p1036_p3 = por %p1035_p2, %p1034_p1 }
   0x8   :  { %p1037_p4 = pnand %p1036_p3, %p1030_p0 }
   0xa   :  { %1040 = shalt.err (!%p1037_p4)
}
   0xb   :  { %s1066_s21 = smov 128   ;;  %s1067_s22 = smov 8  }
   0xc   :  { %35 = dma.hbm_to_vmem [thread:$0]  %s1344_s1, 256, %s30_s19, [#allocation3], %s1066_s21, %s1066_s21, %s1067_s22  }
   0xd   :  { %s1068_s25 = smov [#allocation4]  }
   0xe   :  { %s51_s26 = sshll.u32 %s1068_s25, 4  ;;  %s52_s26 = int_to_ptr.vmem [resolvable:$true] %s51_s26 }
   0xf   :  { %s1049_s27 = scalar_lea.vmem %s52_s26, 1024  ;;  %p1054_p6 = scmp.lt.s32.totalorder %s52_s26, %s52_s26 }
  0x10   :  { %p1050_p5 = scmp.ne.s32.totalorder %s52_s26, %s1049_s27  ;;  %p1055_p7 = scmp.lt.s32.totalorder %s1049_s27, %s1049_s27 }
  0x12   :  { %p1056_p8 = por %p1055_p7, %p1054_p6 }
  0x14   :  { %p1057_p9 = pnand %p1056_p8, %p1050_p5 }
  0x16   :  { %1060 = shalt.err (!%p1057_p9)
}
  0x17   :  { %s1069_s28 = smov 64   ;;  %s1070_s29 = smov 4  }
  0x18   :  { %57 = dma.hbm_to_vmem [thread:$0]  %s1350_s7, 1024, %s52_s26, [#allocation5], %s1069_s28, %s1069_s28, %s1070_s29  }
  0x19   :  { %1061 = dma.done.wait [#allocation3], 256  }
  0x1a   :  { %1062 = vsyncadd [#allocation3], 4294967040 }
  0x1b   :  { %1063 = dma.done.wait [#allocation5], 1024  }
  0x1c   :  { %1064 = vsyncadd [#allocation5], 4294966272  ;;  %v1071_v0 = vmov 0   ;;  %v971_v1 = vld [vmem:[#allocation2 + $0x4] ss:$8 sps:$4 sm:$0xff]   ;;  %vm110_vm0 = vcmask 130048   ;;  %v85_v4 = vlaneseq }
  0x1d   :  { %146 = vmatprep.mubr.bf16.mxu0 %v1071_v0  ;;  %v973_v2 = vld [vmem:[#allocation2] ss:$8 sps:$4 sm:$0xff]   ;;  %128 = vmatprep.subr.bf16.mxu0 %v971_v1  ;;  %v975_v25 = vld [vmem:[%s1348_s5 + $0x78] sm:$0xff]   ;;  %v977_v41 = vld [vmem:[%s1348_s5 + $0x70] sm:$0xff]   ;;  %v1072_v56 = vmov 0.0   ;;  %vm1073_vm1 = vmmov 0  }
  0x1e   :  { %v974_v3 = vld [vmem:[%s1343_s0] sm:$0xff]   ;;  %129 = vmatpush1.bf16.msra.mxu0 %v973_v2  ;;  %v86_v5 = vshrl.u32 %v85_v4, 7  ;;  %854 = vmatprep.subr.bf16.mxu1 %v975_v25  ;;  %v976_v40 = vld [vmem:[%s1348_s5 + $0x38] sm:$0xff]   ;;  %v978_v42 = vld [vmem:[%s1348_s5 + $0x30] sm:$0xff]   ;;  %vm676_vm2 = vcmask 523264   ;;  %vm747_vm3 = vcmask 261120  }
  0x1f   :  { %v83_v7 = vld [vmem:[%s1345_s2] sm:$0x3]  ;;  %855 = vmatpush3.bf16.msra.mxu1 %v976_v40  ;;  %v979_v43 = vld [vmem:[%s1348_s5 + $0x68] sm:$0xff]   ;;  %v983_v47 = vld [vmem:[%s1348_s5 + $0x58] sm:$0xff]   ;;  %902 = vmatprep.subr.bf16.mxu0 %v1072_v56  ;;  %vm796_vm4 = vcmask 31744  }
  0x20   :  { %v1163_v6 = vsub.s32 0, %v86_v5  ;;  %v1168_v8 = vsub.s32 1, %v86_v5  ;;  %856 = vmatprep.subr.bf16.mxu1 %v977_v41  ;;  %v980_v44 = vld [vmem:[%s1348_s5 + $0x28] sm:$0xff]   ;;  %v981_v45 = vld [vmem:[%s1348_s5 + $0x60] sm:$0xff]   ;;  %v984_v48 = vld [vmem:[%s1348_s5 + $0x18] sm:$0xff]  }
  0x21   :  { %808 = vmatmul.mubr.msk.bf16.vlgmr.msra.gmra.mxu0 %vm110_vm0, %v974_v3  ;;  %v982_v46 = vld [vmem:[%s1348_s5 + $0x20] sm:$0xff]   ;;  %v985_v49 = vld [vmem:[%s1348_s5 + $0x50] sm:$0xff]   ;;  %v987_v51 = vld [vmem:[%s1348_s5 + $0x48] sm:$0xff]  }
  0x22   :  { %v88_v9 = vrot.slane %v83_v7, %v1163_v6  ;;  %v92_v10 = vrot.slane %v83_v7, %v1168_v8  ;;  %v986_v50 = vld [vmem:[%s1348_s5 + $0x10] sm:$0xff]   ;;  %v988_v52 = vld [vmem:[%s1348_s5 + $0x8] sm:$0xff]   ;;  %v989_v53 = vld [vmem:[%s1348_s5 + $0x40] sm:$0xff]   ;;  %918 = vmatprep.mubr.msk.bf16.mxu0 %vm1073_vm1, %v1072_v56 }
  0x23   :  { %857 = vmatpush3.bf16.msra.mxu1 %v978_v42  ;;  %v990_v54 = vld [vmem:[%s1348_s5] sm:$0xff]   ;;  %v991_v55 = vld [vmem:[#allocation4 + $0x38] sm:$0xff]   ;;  %v993_v58 = vld [vmem:[#allocation4 + $0x28] sm:$0xff]  }
  0x24   :  { %858 = vmatprep.subr.bf16.mxu1 %v979_v43  ;;  %903 = vmatpush3.bf16.msra.mxu0 %v991_v55  ;;  %v992_v57 = vld [vmem:[#allocation4 + $0x30] sm:$0xff]   ;;  %v994_v59 = vld [vmem:[#allocation4 + $0x20] sm:$0xff]  }
  0x25   :  { %904 = vmatprep.subr.bf16.mxu0 %v1072_v56  ;;  %v194_v2 = vld [vmem:[%s1346_s3] sm:$0x3] }
  0x26   :  { %v199_v5 = vrot.slane %v194_v2, %v1163_v6  ;;  %v203_v7 = vrot.slane %v194_v2, %v1168_v8 }
  0x27   :  { %859 = vmatpush3.bf16.msra.mxu1 %v980_v44 }
  0x28   :  { %860 = vmatprep.subr.bf16.mxu1 %v981_v45  ;;  %905 = vmatpush3.bf16.msra.mxu0 %v992_v57  ;;  %v1004_v45 = vld [vmem:[%s1352_s9 + $0x10] sm:$0xff]  }
  0x29   :  { %906 = vmatprep.subr.bf16.mxu0 %v1072_v56 }
  0x2b   :  { %861 = vmatpush3.bf16.msra.mxu1 %v982_v46  ;;  %v1005_v46 = vld [vmem:[%s1352_s9 + $0x8] sm:$0xff]  }
  0x2c   :  { %862 = vmatprep.subr.bf16.mxu1 %v983_v47  ;;  %907 = vmatpush3.bf16.msra.mxu0 %v993_v58  ;;  %v1006_v47 = vld [vmem:[%s1352_s9] sm:$0xff]  }
  0x2d   :  { %908 = vmatprep.subr.bf16.mxu0 %v1072_v56 }
  0x2f   :  { %863 = vmatpush3.bf16.msra.mxu1 %v984_v48  ;;  %v1007_v48 = vld [vmem:[%s1354_s11 + $0x18] sm:$0xff]  }
  0x30   :  { %864 = vmatprep.subr.bf16.mxu1 %v985_v49  ;;  %909 = vmatpush3.bf16.msra.mxu0 %v994_v59  ;;  %v826_v49 = vld [vmem:[%s1351_s8] ss:$0 sm:$0xff] }
  0x31   :  { %910 = vmatprep.subr.bf16.mxu0 %v1072_v56 }
  0x33   :  { %865 = vmatpush3.bf16.msra.mxu1 %v986_v50 }
  0x34   :  { %866 = vmatprep.subr.bf16.mxu1 %v987_v51 }
  0x37   :  { %867 = vmatpush3.bf16.msra.mxu1 %v988_v52 }
  0x38   :  { %868 = vmatprep.subr.bf16.mxu1 %v989_v53 }
  0x3b   :  { %869 = vmatpush3.bf16.msra.mxu1 %v990_v54 }
  0x3c   :  { %922 = vmatprep.subr.bf16.mxu1 %v1072_v56 }
  0xe1   :  { %v148_v11 = vpop.f32.mrf.mxu0 }
  0xe2   :  { %v149_v12 = vadd.f32 %v148_v11, %v88_v9 }
  0xe3   :  { %v150_v13 = vpop.f32.mrf.mxu0 }
  0xe4   :  { %v151_v14 = vadd.f32 %v150_v13, %v92_v10  ;;  %v157_v16 = vmax.f32 %v149_v12, 0.0 }
  0xe5   :  { %v152_v15 = vpop.f32.mrf.mxu0 }
  0xe6   :  { %v158_v17 = vmax.f32 %v151_v14, 0.0  ;;  %v153_v18 = vadd.f32 %v152_v15, %v88_v9  ;;  %v210_v9 = vld [vmem:[%s1347_s4] sm:$0x3] }
  0xe7   :  { %v154_v19 = vpop.f32.mrf.mxu0  ;;  %v215_v12 = vrot.slane %v210_v9, %v1163_v6  ;;  %v219_v13 = vrot.slane %v210_v9, %v1168_v8  ;;  %v996_v6 = vld [vmem:[#allocation4 + $0x10] sm:$0xff]   ;;  %v997_v8 = vld [vmem:[#allocation4 + $0x8] sm:$0xff]  }
  0xe8   :  { %v155_v20 = vadd.f32 %v154_v19, %v92_v10  ;;  %v161_v21 = vadd.f32 %v158_v17, %v157_v16  ;;  %v159_v22 = vmax.f32 %v153_v18, 0.0 }
  0xea   :  { %v160_v23 = vmax.f32 %v155_v20, 0.0  ;;  %162 = vadd.xlane.f32.xlu0 %v161_v21 }
  0xec   :  { %v164_v24 = vadd.f32 %v160_v23, %v159_v22 }
  0xee   :  { %165 = vadd.xlane.f32.xlu0 %v164_v24 }
 0x173   :  { %v163_v26 = vpop.xlane.xlu0 %162 }
 0x174   :  { %v168_v27 = vmul.f32 0.00390625, %v163_v26  ;;  %v995_v26 = vld [vmem:[#allocation4 + $0x18] sm:$0xff]  }
 0x175   :  { %911 = vmatpush3.bf16.msra.mxu0 %v995_v26 }
 0x176   :  { %v1175_v28 = vsub.f32 %v157_v16, %v168_v27  ;;  %v1177_v29 = vsub.f32 %v158_v17, %v168_v27  ;;  %912 = vmatprep.subr.bf16.mxu0 %v1072_v56  ;;  %v998_v27 = vld [vmem:[#allocation4] sm:$0xff]  }
 0x177   :  { %v166_v30 = vpop.xlane.xlu0 %165 }
 0x178   :  { %v169_v31 = vmul.f32 0.00390625, %v166_v30  ;;  %v174_v32 = vmul.f32 %v1175_v28, %v1175_v28  ;;  %v175_v33 = vmul.f32 %v1177_v29, %v1177_v29  ;;  %v1001_v30 = vld [vmem:[%s1352_s9 + $0x28] sm:$0xff]  }
 0x179   :  { %913 = vmatpush3.bf16.msra.mxu0 %v996_v6 }
 0x17a   :  { %v1183_v34 = vsub.f32 %v159_v22, %v169_v31  ;;  %v1185_v35 = vsub.f32 %v160_v23, %v169_v31  ;;  %v178_v36 = vadd.f32 %v175_v33, %v174_v32  ;;  %914 = vmatprep.subr.bf16.mxu0 %v1072_v56  ;;  %v1002_v31 = vld [vmem:[%s1352_s9 + $0x20] sm:$0xff]   ;;  %v1003_v32 = vld [vmem:[%s1352_s9 + $0x18] sm:$0xff]  }
 0x17c   :  { %179 = vadd.xlane.f32.xlu1 %v178_v36  ;;  %v176_v37 = vmul.f32 %v1183_v34, %v1183_v34  ;;  %v177_v38 = vmul.f32 %v1185_v35, %v1185_v35  ;;  %v809_v36 = vld [vmem:[%s1349_s6] ss:$0 sm:$0xff] }
 0x17d   :  { %915 = vmatpush3.bf16.msra.mxu0 %v997_v8 }
 0x17e   :  { %v181_v39 = vadd.f32 %v177_v38, %v176_v37  ;;  %916 = vmatprep.subr.bf16.mxu0 %v1072_v56 }
 0x180   :  { %182 = vadd.xlane.f32.xlu1 %v181_v39 }
 0x181   :  { %917 = vmatpush3.bf16.msra.mxu0 %v998_v27 }
 0x182   :  { %942 = vmatprep.subr.bf16.mxu0 %v1072_v56 }
 0x205   :  { %v180_v60 = vpop.xlane.xlu1 %179 }
 0x206   :  { %v184_v61 = vmul.f32 0.00390625, %v180_v60  ;;  %v1008_v60 = vld [vmem:[%s1354_s11 + $0x10] sm:$0xff]  }
 0x208   :  { %v186_v62 = vadd.f32 1e-05, %v184_v61  ;;  %v1009_v61 = vld [vmem:[%s1354_s11 + $0x8] sm:$0xff]  }
 0x209   :  { %v183_v63 = vpop.xlane.xlu1 %182 }
 0x20a   :  { %1013 = vrsqrt.f32 %v186_v62  ;;  %v185_v0 = vmul.f32 0.00390625, %v183_v63  ;;  %v1010_v62 = vld [vmem:[%s1354_s11] sm:$0xff]  }
 0x20b   :  { %v835_v63 = vld [vmem:[%s1353_s10] ss:$0 sm:$0xff] }
 0x20c   :  { %v187_v1 = vadd.f32 1e-05, %v185_v0 }
 0x20e   :  { %1015 = vrsqrt.f32 %v187_v1 }
 0x217   :  { %v1014_v3 = vpop.eup %1013 }
 0x218   :  { %v191_v4 = vmul.f32 %v1014_v3, %v1177_v29  ;;  %v190_v10 = vmul.f32 %v1014_v3, %v1175_v28  ;;  %v999_v28 = vld [vmem:[%s1352_s9 + $0x38] sm:$0xff]   ;;  %v1000_v29 = vld [vmem:[%s1352_s9 + $0x30] sm:$0xff]  }
 0x21a   :  { %v207_v15 = vmul.f32 %v203_v7, %v191_v4  ;;  %v206_v17 = vmul.f32 %v199_v5, %v190_v10 }
 0x21b   :  { %v1016_v11 = vpop.eup %1015 }
 0x21c   :  { %v193_v14 = vmul.f32 %v1016_v11, %v1185_v35  ;;  %v192_v16 = vmul.f32 %v1016_v11, %v1183_v34  ;;  %v223_v20 = vadd.f32 %v219_v13, %v207_v15  ;;  %v222_v22 = vadd.f32 %v215_v12, %v206_v17  ;;  %v1011_v11 = vld [vmem:[%s1356_s13 + $0x8] sm:$0xff]  }
 0x21e   :  { %v209_v18 = vmul.f32 %v203_v7, %v193_v14  ;;  %v208_v19 = vmul.f32 %v199_v5, %v192_v16 }
 0x220   :  { %v225_v21 = vadd.f32 %v219_v13, %v209_v18  ;;  %v224_v23 = vadd.f32 %v215_v12, %v208_v19  ;;  %v1012_v12 = vld [vmem:[%s1356_s13] sm:$0xff]  }
 0x221   :  { %v844_v13 = vld [vmem:[%s1355_s12] ss:$0 sm:$0xff] }
 0x222   :  { %v227_v24 = vpack.c.bf16 %v225_v21, %v223_v20  ;;  %v226_v25 = vpack.c.bf16 %v224_v23, %v222_v22 }
 0x224   :  { %395 = vmatprep.mubr.bf16.mxu1 %v227_v24 }
 0x225   :  { %396 = vmatmul.mubr.bf16.vlgmr.msra.gmra.mxu1 %v226_v25 }
 0x226   :  { %938 = vmatprep.mubr.msk.bf16.mxu1 %vm1073_vm1, %v1072_v56  ;;  %923 = vmatpush3.bf16.msra.mxu1 %v999_v28 }
 0x227   :  { %924 = vmatprep.subr.bf16.mxu1 %v1072_v56 }
 0x22a   :  { %925 = vmatpush3.bf16.msra.mxu1 %v1000_v29 }
 0x22b   :  { %926 = vmatprep.subr.bf16.mxu1 %v1072_v56 }
 0x22e   :  { %927 = vmatpush3.bf16.msra.mxu1 %v1001_v30 }
 0x22f   :  { %928 = vmatprep.subr.bf16.mxu1 %v1072_v56 }
 0x232   :  { %929 = vmatpush3.bf16.msra.mxu1 %v1002_v31 }
 0x233   :  { %930 = vmatprep.subr.bf16.mxu1 %v1072_v56 }
 0x236   :  { %931 = vmatpush3.bf16.msra.mxu1 %v1003_v32 }
 0x237   :  { %932 = vmatprep.subr.bf16.mxu1 %v1072_v56 }
 0x23a   :  { %933 = vmatpush3.bf16.msra.mxu1 %v1004_v45 }
 0x23b   :  { %934 = vmatprep.subr.bf16.mxu1 %v1072_v56 }
 0x23e   :  { %935 = vmatpush3.bf16.msra.mxu1 %v1005_v46 }
 0x23f   :  { %936 = vmatprep.subr.bf16.mxu1 %v1072_v56 }
 0x242   :  { %937 = vmatpush3.bf16.msra.mxu1 %v1006_v47 }
 0x2e5   :  { %v870_v33 = vpop.f32.mrf.mxu1 }
 0x2e7   :  { %v871_v34 = vpop.f32.mrf.mxu1 }
 0x2e8   :  { %v872_v35 = vadd.f32 %v871_v34, %v870_v33 }
 0x2e9   :  { %v873_v37 = vpop.f32.mrf.mxu1 }
 0x2ea   :  { %v398_v39 = vadd.f32 %v872_v35, %v809_v36 }
 0x2eb   :  { %v874_v38 = vpop.f32.mrf.mxu1 }
 0x2ec   :  { %v875_v40 = vadd.f32 %v874_v38, %v873_v37  ;;  %v404_v42 = vmax.f32 %v398_v39, 0.0 }
 0x2ee   :  { %v401_v41 = vadd.f32 %v875_v40, %v809_v36 }
 0x2f0   :  { %v405_v43 = vmax.f32 %v401_v41, 0.0 }
 0x2f2   :  { %v406_v44 = vpack.c.bf16 %v405_v43, %v404_v42 }
 0x2f4   :  { %919 = vmatmul.mubr.bf16.vlgmr.msra.gmra.mxu0 %v406_v44 }
 0x2f5   :  { %950 = vmatprep.mubr.msk.bf16.mxu0 %vm1073_vm1, %v1072_v56  ;;  %943 = vmatpush3.bf16.msra.mxu0 %v1007_v48 }
 0x2f6   :  { %944 = vmatprep.subr.bf16.mxu0 %v1072_v56 }
 0x2f9   :  { %945 = vmatpush3.bf16.msra.mxu0 %v1008_v60 }
 0x2fa   :  { %946 = vmatprep.subr.bf16.mxu0 %v1072_v56 }
 0x2fd   :  { %947 = vmatpush3.bf16.msra.mxu0 %v1009_v61 }
 0x2fe   :  { %948 = vmatprep.subr.bf16.mxu0 %v1072_v56 }
 0x301   :  { %949 = vmatpush3.bf16.msra.mxu0 %v1010_v62 }
 0x302   :  { %954 = vmatprep.subr.bf16.mxu0 %v1072_v56 }
 0x3b4   :  { %v512_v50 = vpop.f32.mrf.mxu0 }
 0x3b5   :  { %v513_v52 = vadd.f32 %v826_v49, %v512_v50 }
 0x3b6   :  { %v920_v51 = vpop.f32.mrf.mxu0 }
 0x3b7   :  { %v519_v57 = vmax.f32 %v513_v52, 0.0 }
 0x3b8   :  { %v515_v53 = vpop.f32.mrf.mxu0 }
 0x3b9   :  { %v516_v54 = vadd.f32 %v826_v49, %v515_v53 }
 0x3ba   :  { %v921_v55 = vpop.f32.mrf.mxu0 }
 0x3bb   :  { %v520_v58 = vmax.f32 %v516_v54, 0.0 }
 0x3bd   :  { %v521_v59 = vpack.c.bf16 %v520_v58, %v519_v57 }
 0x3bf   :  { %939 = vmatmul.mubr.bf16.vlgmr.msra.gmra.mxu1 %v521_v59 }
 0x47f   :  { %v627_v0 = vpop.f32.mrf.mxu1 }
 0x480   :  { %v628_v2 = vadd.f32 %v835_v63, %v627_v0 }
 0x481   :  { %v940_v1 = vpop.f32.mrf.mxu1 }
 0x482   :  { %v634_v7 = vmax.f32 %v628_v2, 0.0 }
 0x483   :  { %v630_v3 = vpop.f32.mrf.mxu1 }
 0x484   :  { %v631_v4 = vadd.f32 %v835_v63, %v630_v3 }
 0x485   :  { %v941_v5 = vpop.f32.mrf.mxu1 }
 0x486   :  { %v635_v9 = vmax.f32 %v631_v4, 0.0 }
 0x488   :  { %v636_v10 = vpack.c.bf16 %v635_v9, %v634_v7 }
 0x48a   :  { %951 = vmatmul.mubr.msk.bf16.vlgmr.msra.gmra.mxu0 %vm676_vm2, %v636_v10 }
 0x48b   :  { %958 = vmatprep.mubr.msk.bf16.mxu0 %vm1073_vm1, %v1072_v56  ;;  %955 = vmatpush3.bf16.msra.mxu0 %v1011_v11 }
 0x48c   :  { %956 = vmatprep.subr.bf16.mxu0 %v1072_v56  ;;  %v850_v56 = vld [vmem:[%s1357_s14] ss:$0 sm:$0xff] }
 0x48f   :  { %957 = vmatpush3.bf16.msra.mxu0 %v1012_v12 }
 0x54a   :  { %v714_v14 = vpop.f32.mrf.mxu0 }
 0x54b   :  { %v715_v16 = vadd.f32 %v844_v13, %v714_v14 }
 0x54c   :  { %v952_v15 = vpop.f32.mrf.mxu0 }
 0x54d   :  { %v721_v20 = vmax.f32 %v715_v16, 0.0 }
 0x54e   :  { %v717_v17 = vpop.f32.mrf.mxu0 }
 0x54f   :  { %v718_v18 = vadd.f32 %v844_v13, %v717_v17 }
 0x550   :  { %v953_v19 = vpop.f32.mrf.mxu0 }
 0x551   :  { %v722_v21 = vmax.f32 %v718_v18, 0.0 }
 0x553   :  { %v723_v22 = vpack.c.bf16 %v722_v21, %v721_v20 }
 0x555   :  { %959 = vmatmul.mubr.msk.bf16.vlgmr.msra.gmra.mxu0 %vm747_vm3, %v723_v22 }
 0x615   :  { %v785_v23 = vpop.f32.mrf.mxu0 }
 0x616   :  { %v786_v24 = vadd.f32 %v850_v56, %v785_v23 }
 0x617   :  { %v960_v25 = vpop.f32.mrf.mxu0 }
 0x618   :  { %1017 = vtanh.f32 %v786_v24 }
 0x619   :  { %v788_v26 = vpop.f32.mrf.mxu0 }
 0x61a   :  { %v789_v6 = vadd.f32 %v850_v56, %v788_v26 }
 0x61b   :  { %v961_v8 = vpop.f32.mrf.mxu0 }
 0x61c   :  { %1019 = vtanh.f32 %v789_v6 }
 0x625   :  { %v1018_v27 = vpop.eup %1017 }
 0x626   :  { %v794_v28 = vmul.f32 2.0, %v1018_v27 }
 0x628   :  { %797 = vst.msk [vmem:[%s1358_s15] sm:$0xff] %vm796_vm4, %v794_v28 }
 0x629   :  { %v1020_v29 = vpop.eup %1019 }
 0x62a   :  { %v795_v30 = vmul.f32 2.0, %v1020_v29 }
 0x62c   :  { %798 = vst.msk [vmem:[%s1358_s15 + $0x8] sm:$0xff] %vm796_vm4, %v795_v30 }
 0x62d   :  { %803 = vsyncpa [#allocation3], 1 }
 0x62e   :  { %804 = vsyncpa [#allocation5], 1 }

</bundles_post_ra>
